<compile_context>
chip_gen: v6e
topology: v6e:2x2x1
jax: 0.10.0
libtpu: 0.0.40
codegen_flags: <defaults>
</compile_context>

<pallas_src>
from functools import partial

import jax
import jax.numpy as jnp
from jax.experimental import pallas as pl
from jax.experimental.pallas import tpu as pltpu


# ---------------------------------------------------------------------------
# Pass 1: un-normalized new_attn[b, j] = sum_i key_attn[b, i] * sigmoid(lin[b,i,j])
# ---------------------------------------------------------------------------
def _edge_attend_kernel(lin_ref, stack_ref, ptr_ref, out_ref, *,
                        n_rows, row_tile, mask_rows):
    it = pl.program_id(2)

    @pl.when(it == 0)
    def _init():
        out_ref[...] = jnp.zeros_like(out_ref)

    # Pre-sigmoid logits for this (row tile, column tile); lane-dense bf16 in
    # HBM, upcast right after load (v5e has no bf16 VPU; DMA savings remain).
    lin = lin_ref[0].astype(jnp.float32)                       # (t_i, t_j)
    # Overflow-safe sigmoid; tanh is a single EUP op per element.
    edge_attn = 0.5 + 0.5 * jnp.tanh(0.5 * lin)                # (t_i, t_j)

    # read_from_stack for this row tile: key[b, i] = sum_s att[b, i, s]*ptr[b, s]
    key = jnp.sum(stack_ref[...] * ptr_ref[0], axis=-1)        # (1, t_i)

    if mask_rows:
        # The last row tile overhangs N; the padded rows may hold arbitrary
        # bits (even NaN), so select-mask BOTH matmul operands (where-select,
        # not multiply, so NaN padding cannot leak through).
        rows_left = n_rows - it * row_tile
        ri = jax.lax.broadcasted_iota(jnp.int32, (row_tile, 1), 0)
        edge_attn = jnp.where(ri < rows_left, edge_attn, 0.0)
        rj = jax.lax.broadcasted_iota(jnp.int32, (1, row_tile), 1)
        key = jnp.where(rj < rows_left, key, 0.0)

    # (1, t_i) x (t_i, t_j) matvec on the MXU, bf16 operands, f32 accumulation
    # into the resident per-(batch, column-tile) output block (reduction over
    # the innermost "arbitrary" grid axis).
    out_ref[...] += jnp.dot(key.astype(jnp.bfloat16),
                            edge_attn.astype(jnp.bfloat16),
                            preferred_element_type=jnp.float32)[None]


# ---------------------------------------------------------------------------
# Pass 2: write_to_stack with the global-max normalization (broadcast in-kernel)
# ---------------------------------------------------------------------------
def _stack_write_kernel(scale_ref, new_ref, att_ref, ptr_ref, out_ref):
    att = att_ref[0]                                   # (t_n, S)
    new = scale_ref[0] * new_ref[0]                    # (t_n, 1), normalized
    ptr = ptr_ref[0]                                   # (1, S)
    # write_to_stack: new*ptr + att*(1-ptr), as a single FMA with broadcasts.
    out_ref[0] = att + ptr * (new - att)


# ---------------------------------------------------------------------------
# Tiling helpers
# ---------------------------------------------------------------------------
def _vmem_capacity_bytes():
    try:
        return int(pltpu.get_tpu_info().vmem_capacity_bytes)
    except Exception:
        return 64 * 1024 * 1024  # conservative fallback (v7x per-TC VMEM)


def _row_tile(n, cap):
    """Largest multiple of 8 <= cap that never exceeds the 8-aligned floor of n
    (so a block never overhangs by more than one partial tile).  n < 8 -> n."""
    if n < 8:
        return n
    return max(8, (min(cap, (n // 8) * 8) // 8) * 8)


# ---------------------------------------------------------------------------
# Forward
# ---------------------------------------------------------------------------
def transfer_edge(node_feat, query, edge_matrices, att_stack, stack_ptr, weight, bias):
    """Pallas forward of TransferEdge.  Returns (new_att_stack, stack_ptr)."""
    del node_feat  # only used for device placement in the PyTorch module
    B, N, S = att_stack.shape

    # Linear(D,4) + softmax over the 4 edge types: a tiny 4xD matvec.
    q_soft = jax.nn.softmax(
        weight.astype(jnp.float32) @ query.astype(jnp.float32)
        + bias.astype(jnp.float32))                                        # (4,)

    # Single fused XLA pass over the dominant operand: weighted edge-type
    # reduction, emitted as lane-dense bf16 logits.  edge_matrices (B,N,N,4 f32)
    # is read exactly once; no transposed copy is materialized.
    lin = jnp.sum(edge_matrices.astype(jnp.float32) * q_soft,
                  axis=-1).astype(jnp.bfloat16)                            # (B,N,N)

    att_f32 = att_stack.astype(jnp.float32)
    ptr3 = stack_ptr.astype(jnp.float32).reshape(B, 1, S)

    # ----- generation-aware tiling / VMEM budgeting -------------------------
    vmem_cap = _vmem_capacity_bytes()
    vmem_limit = int(min(vmem_cap * 7 // 8, 112 * 1024 * 1024))
    edge_budget = min(48 * 1024 * 1024, vmem_cap // 3)  # double-buffered logits

    # Column (output) tiles: only split when the batch axis alone cannot feed
    # both v7x TensorCores and the split keeps the lane dim 128-aligned.
    t_j = N // 2 if (B == 1 and N % 256 == 0) else N
    n_jt = pl.cdiv(N, t_j)

    # Row (reduction) tiles, budgeted against the double-buffered bf16 block.
    t_i = _row_tile(N, max(8, edge_budget // (2 * 2 * t_j)))
    n_it = pl.cdiv(N, t_i)
    mask_rows = (N % t_i) != 0

    kernel = partial(_edge_attend_kernel, n_rows=N, row_tile=t_i,
                     mask_rows=mask_rows)

    # NOTE: if profiling ever shows exposed DMA at small t_i, sweep
    # pipeline_mode=pl.Buffered(3) on the logits BlockSpec (VMEM permitting).
    raw = pl.pallas_call(
        kernel,
        grid=(B, n_jt, n_it),
        in_specs=[
            pl.BlockSpec((1, t_i, t_j), lambda b, jt, it: (b, it, jt)),    # logits
            pl.BlockSpec((1, t_i, S), lambda b, jt, it: (b, it, 0)),       # att_stack
            pl.BlockSpec((1, 1, S), lambda b, jt, it: (b, 0, 0)),          # stack_ptr
        ],
        out_specs=pl.BlockSpec((1, 1, t_j), lambda b, jt, it: (b, 0, jt)),
        out_shape=jax.ShapeDtypeStruct((B, 1, N), jnp.float32),
        compiler_params=pltpu.CompilerParams(
            dimension_semantics=("parallel", "parallel", "arbitrary"),
            vmem_limit_bytes=vmem_limit),
    )(lin, att_f32, ptr3)

    # Global max over ALL batches (PyTorch semantics), clamped to >= 1.  This
    # couples every grid point, so it lives between the two passes as a scalar.
    new_attn = raw[:, 0, :]                                                # (B, N)
    norm = jnp.maximum(jnp.max(new_attn), 1.0)
    scale = (1.0 / norm).reshape(1).astype(jnp.float32)
    new3 = new_attn.reshape(B, N, 1)

    # Pass 2: soft stack write.  No repeat/tile materialization: new_attn is a
    # (B,N,1) stream, stack_ptr a (B,1,S) stream, broadcast inside the kernel.
    t_n = _row_tile(N, 1024)
    n_nt = pl.cdiv(N, t_n)

    new_stack = pl.pallas_call(
        _stack_write_kernel,
        grid=(B, n_nt),
        in_specs=[
            pl.BlockSpec(memory_space=pltpu.MemorySpace.SMEM),             # scale
            pl.BlockSpec((1, t_n, 1), lambda b, nt: (b, nt, 0)),           # new_attn
            pl.BlockSpec((1, t_n, S), lambda b, nt: (b, nt, 0)),           # att_stack
            pl.BlockSpec((1, 1, S), lambda b, nt: (b, 0, 0)),              # stack_ptr
        ],
        out_specs=pl.BlockSpec((1, t_n, S), lambda b, nt: (b, nt, 0)),
        out_shape=jax.ShapeDtypeStruct((B, N, S), jnp.float32),
        compiler_params=pltpu.CompilerParams(
            dimension_semantics=("parallel", "parallel"),
            vmem_limit_bytes=vmem_limit),
    )(scale, new3, att_f32, ptr3)

    return new_stack, stack_ptr


# ---------------------------------------------------------------------------
# Pure-JAX reference mirroring the PyTorch forward (exact f32)
# ---------------------------------------------------------------------------
def transfer_edge_reference(node_feat, query, edge_matrices, att_stack, stack_ptr,
                            weight, bias):
    del node_feat
    q = jax.nn.softmax(weight @ query + bias)                                    # (4,)
    edge_attn = jax.nn.sigmoid(
        jnp.sum(edge_matrices * q[None, None, None, :], axis=3))                # (B,N,N)
    key_attn = jnp.sum(att_stack * stack_ptr[:, None, :], axis=-1)[:, None, :]  # (B,1,N)
    new_attn = jnp.matmul(key_attn, edge_attn,
                          precision=jax.lax.Precision.HIGHEST)                  # (B,1,N)
    new_attn = jnp.transpose(new_attn, (0, 2, 1))                               # (B,N,1)
    norm = jnp.max(new_attn)
    norm = jnp.where(norm <= 1.0, 1.0, norm)
    new_attn = new_attn / norm
    ptr_e = stack_ptr[:, None, :]
    new_stack = new_attn * ptr_e + att_stack * (1.0 - ptr_e)
    return new_stack, stack_ptr


def _run_case(seed, B, N, S, D, atol=5e-3, rtol=5e-3):
    key = jax.random.PRNGKey(seed)
    k_nf, k_q, k_em, k_st, k_w, k_b = jax.random.split(key, 6)

    node_feat = jax.random.normal(k_nf, (B, N, D), dtype=jnp.float32)
    query = jax.random.normal(k_q, (D,), dtype=jnp.float32)
    edge_matrices = jax.random.uniform(k_em, (B, N, N, 4), dtype=jnp.float32)
    att_stack = jax.random.uniform(k_st, (B, N, S), dtype=jnp.float32)
    stack_ptr = jax.nn.one_hot(jnp.arange(B) % S, S, dtype=jnp.float32)     # (B, S)
    weight = jax.random.normal(k_w, (4, D), dtype=jnp.float32) * 0.1
    bias = jax.random.normal(k_b, (4,), dtype=jnp.float32) * 0.1

    out_stack, out_ptr = transfer_edge(node_feat, query, edge_matrices,
                                       att_stack, stack_ptr, weight, bias)
    out_stack = jax.block_until_ready(out_stack)

    ref_stack, ref_ptr = transfer_edge_reference(node_feat, query, edge_matrices,
                                                 att_stack, stack_ptr, weight, bias)

    max_err = float(jnp.max(jnp.abs(out_stack - ref_stack)))
    assert jnp.allclose(out_stack, ref_stack, atol=atol, rtol=rtol), (
        f"(B={B},N={N},S={S}) mismatch vs reference (max abs err {max_err})")
    assert jnp.allclose(out_ptr, ref_ptr), "stack_ptr should pass through unchanged"


if __name__ == "__main__":
    # Primary demo: batch=2, nodes=16, stack=8, query hidden dim=32.
    _run_case(0, B=2, N=16, S=8, D=32)
    # Non-divisible node count exercises the pl.cdiv + masked-last-tile path.
    _run_case(1, B=2, N=20, S=8, D=32)
    # B == 1 exercises the column split that keeps both v7x TensorCores busy.
    _run_case(2, B=1, N=256, S=8, D=32)

    print("KERNEL_OK")
</pallas_src>

<mosaic_0001>
module attributes {stable_mosaic.version = 11 : i64} {
  func.func @_edge_attend_kernel(%arg0: i32, %arg1: i32, %arg2: i32, %arg3: memref<1x16x16xbf16, #tpu.memory_space<vmem>>, %arg4: memref<1x16x8xf32, #tpu.memory_space<vmem>>, %arg5: memref<1x1x8xf32, #tpu.memory_space<vmem>>, %arg6: memref<1x1x16xf32, #tpu.memory_space<vmem>>) attributes {dimension_semantics = [#tpu.dimension_semantics<parallel>, #tpu.dimension_semantics<parallel>, #tpu.dimension_semantics<arbitrary>], iteration_bounds = array<i64: 2, 1, 1>, scalar_prefetch = 0 : i64, scratch_operands = 0 : i64, tpu.core_type = #tpu.core_type<tc>, window_params = [{transform_indices = @transform_0, window_bounds = array<i64: 1, 16, 16>}, {transform_indices = @transform_1, window_bounds = array<i64: 1, 16, 8>}, {transform_indices = @transform_2, window_bounds = array<i64: 1, 1, 8>}, {transform_indices = @transform_3, window_bounds = array<i64: 1, 1, 16>}]} {
    %c0_i32 = arith.constant 0 : i32
    %0 = arith.cmpi eq, %arg2, %c0_i32 : i32
    %1 = arith.extui %0 : i1 to i32
    %c0_i32_0 = arith.constant 0 : i32
    %2 = arith.cmpi ne, %1, %c0_i32_0 : i32
    scf.if %2 {
      %cst_19 = arith.constant 0.000000e+00 : f32
      %27 = vector.broadcast %cst_19 : f32 to vector<1x1x16xf32>
      %c0_20 = arith.constant 0 : index
      %c0_21 = arith.constant 0 : index
      %c0_22 = arith.constant 0 : index
      %28 = vector.load %arg6[%c0_20, %c0_21, %c0_22] : memref<1x1x16xf32, #tpu.memory_space<vmem>>, vector<1x1x16xf32>
      tpu.vector_store %arg6[%c0_20, %c0_21, %c0_22], %27 {strides = array<i32>} : memref<1x1x16xf32, #tpu.memory_space<vmem>>, vector<1x1x16xf32>,
    } else {
    }
    %c0 = arith.constant 0 : index
    %c0_1 = arith.constant 0 : index
    %c0_2 = arith.constant 0 : index
    %3 = vector.load %arg3[%c0, %c0_1, %c0_2] : memref<1x16x16xbf16, #tpu.memory_space<vmem>>, vector<1x16x16xbf16>
    %4 = vector.shape_cast %3 : vector<1x16x16xbf16> to vector<16x16xbf16>
    %5 = arith.extf %4 : vector<16x16xbf16> to vector<16x16xf32>
    %cst = arith.constant 5.000000e-01 : f32
    %6 = vector.broadcast %cst : f32 to vector<16x16xf32>
    %7 = arith.mulf %6, %5 : vector<16x16xf32>
    %8 = math.tanh %7 : vector<16x16xf32>
    %cst_3 = arith.constant 5.000000e-01 : f32
    %9 = vector.broadcast %cst_3 : f32 to vector<16x16xf32>
    %10 = arith.mulf %9, %8 : vector<16x16xf32>
    %cst_4 = arith.constant 5.000000e-01 : f32
    %11 = vector.broadcast %cst_4 : f32 to vector<16x16xf32>
    %12 = arith.addf %11, %10 : vector<16x16xf32>
    %c0_5 = arith.constant 0 : index
    %c0_6 = arith.constant 0 : index
    %c0_7 = arith.constant 0 : index
    %13 = vector.load %arg4[%c0_5, %c0_6, %c0_7] : memref<1x16x8xf32, #tpu.memory_space<vmem>>, vector<1x16x8xf32>
    %c0_8 = arith.constant 0 : index
    %c0_9 = arith.constant 0 : index
    %c0_10 = arith.constant 0 : index
    %14 = vector.load %arg5[%c0_8, %c0_9, %c0_10] : memref<1x1x8xf32, #tpu.memory_space<vmem>>, vector<1x1x8xf32>
    %15 = vector.shape_cast %14 : vector<1x1x8xf32> to vector<1x8xf32>
    %16 = vector.shape_cast %15 : vector<1x8xf32> to vector<1x1x8xf32>
    %17 = vector.broadcast %16 : vector<1x1x8xf32> to vector<1x16x8xf32>
    %18 = arith.mulf %13, %17 : vector<1x16x8xf32>
    %cst_11 = arith.constant dense<0.000000e+00> : vector<1x16xf32>
    %19 = vector.multi_reduction <add>, %18, %cst_11 [2] : vector<1x16x8xf32> to vector<1x16xf32>
    %c0_12 = arith.constant 0 : index
    %c0_13 = arith.constant 0 : index
    %c0_14 = arith.constant 0 : index
    %20 = vector.load %arg6[%c0_12, %c0_13, %c0_14] : memref<1x1x16xf32, #tpu.memory_space<vmem>>, vector<1x1x16xf32>
    %21 = arith.truncf %19 : vector<1x16xf32> to vector<1x16xbf16>
    %22 = arith.truncf %12 : vector<16x16xf32> to vector<16x16xbf16>
    %cst_15 = arith.constant dense<0.000000e+00> : vector<1x16xf32>
    %23 = tpu.matmul %21, %22, %cst_15 {dimension_numbers = #tpu.dot_dimension_numbers<[1], [0], [0], [1], [0, 0, 1, 1], [], []>} : vector<1x16xbf16>, vector<16x16xbf16>, vector<1x16xf32> -> vector<1x16xf32>
    %24 = vector.shape_cast %23 : vector<1x16xf32> to vector<1x1x16xf32>
    %25 = arith.addf %20, %24 : vector<1x1x16xf32>
    %c0_16 = arith.constant 0 : index
    %c0_17 = arith.constant 0 : index
    %c0_18 = arith.constant 0 : index
    %26 = vector.load %arg6[%c0_16, %c0_17, %c0_18] : memref<1x1x16xf32, #tpu.memory_space<vmem>>, vector<1x1x16xf32>
    tpu.vector_store %arg6[%c0_16, %c0_17, %c0_18], %25 {strides = array<i32>} : memref<1x1x16xf32, #tpu.memory_space<vmem>>, vector<1x1x16xf32>,
    return
  }
  func.func @transform_0(%arg0: i32, %arg1: i32, %arg2: i32) -> (i32, i32, i32) {
    %c0_i32 = arith.constant 0 : i32
    return %arg0, %arg2, %arg1 : i32, i32, i32
  }
  func.func @transform_1(%arg0: i32, %arg1: i32, %arg2: i32) -> (i32, i32, i32) {
    %c0_i32 = arith.constant 0 : i32
    %c0_i32_0 = arith.constant 0 : i32
    return %arg0, %arg2, %c0_i32 : i32, i32, i32
  }
  func.func @transform_2(%arg0: i32, %arg1: i32, %arg2: i32) -> (i32, i32, i32) {
    %c0_i32 = arith.constant 0 : i32
    %c0_i32_0 = arith.constant 0 : i32
    %c0_i32_1 = arith.constant 0 : i32
    return %arg0, %c0_i32, %c0_i32_0 : i32, i32, i32
  }
  func.func @transform_3(%arg0: i32, %arg1: i32, %arg2: i32) -> (i32, i32, i32) {
    %c0_i32 = arith.constant 0 : i32
    %c0_i32_0 = arith.constant 0 : i32
    return %arg0, %c0_i32, %arg1 : i32, i32, i32
  }
}

</mosaic_0001>

<bundles_post_ra>
// kernel: tpu_custom_call.1
= control target key start
LH: loop header
LB: loop body
LE: loop exit
PB: predicated region body
PF: predicated region fallthrough
CT: control target
= control target key end

     0   :  { %8 = vsyncpa [#allocation3], 0  ;;  %s800_s0 = inlined_call_operand.vmem [shape: bf16[2,16,16], index: 0, kind: input, shape index: {}]   ;;  %s801_s1 = inlined_call_operand.vmem [shape: f32[2,16,8], index: 1, kind: input, shape index: {}]   ;;  %s802_s2 = inlined_call_operand.vmem [shape: f32[2,1,8], index: 2, kind: input, shape index: {}]   ;;  %s803_s3 = inlined_call_operand.hbm [shape: f32[2,1,16], index: 3, kind: output, shape index: {}]  }
   0x1   :  { %10 = vsyncpa [#allocation3 + $0x1], 0  ;;  %s677_s12 = smov 0   ;;  %s679_s13 = smov 0  }
   0x2   :  { %s681_s14 = smov 0   ;;  %s683_s15 = smov 0  }
   0x3   :  { %s685_s16 = smov 0   ;;  %s687_s17 = smov 0  }
   0x4 LB: > { %s487_s18 = sadd.s32 4294967295, %s652_s17   ;;  %s488_s19 = sadd.s32 4294967294, %s652_s17   ;;  %s652_s17 = sphi %s687_s17, %s16_s17   ;;  %s648_s16 = sphi %s685_s16, %s810_s16   ;;  %s644_s15 = sphi %s683_s15, %s809_s15   ;;  %s640_s14 = sphi %s681_s14, %s808_s14   ;;  %s636_s13 = sphi %s679_s13, %s807_s13   ;;  %s632_s12 = sphi %s677_s12, %s806_s12  }
   0x5   : > { %s35_s20 = sadd.s32 1, %s648_s16  ;;  %s128_s21 = sadd.s32 1, %s640_s14 }
   0x6   : > { %p37_p0 = scmp.ge.s32.totalorder %s35_s20, 2  ;;  %p138_p1 = scmp.ne.s32.totalorder %s640_s14, %s636_s13 }
   0x7   : > { %p139_p2 = scmp.eq.s32.totalorder %s487_s18, 1  ;;  %p144_p3 = scmp.ne.s32.totalorder %s636_s13, %s632_s12 }
   0x8   : > { %s812_s20 = smov (%p37_p0, %s35_s20), 0  ;;  %p145_p5 = scmp.eq.s32.totalorder %s488_s19, 1 }
   0x9   : > { %p717_p4 = por %p139_p2, %p138_p1  ;;  %s123_s23 = ssub.s32 %s648_s16, %s812_s20 }
   0xa   : > { %p491_p6 = scmp.ge.s32.totalorder %s652_s17, 1  ;;  %p126_p7 = scmp.eq.s32.totalorder %s123_s23, 0 }
   0xb   : > { %p724_p8 = por %p145_p5, %p144_p3  ;;  %p198_p9 = scmp.lt.s32.totalorder %s652_s17, 3 }
   0xc   : > { %s730_s25 = scalar_select %p126_p7, %s640_s14, %s128_s21  }
   0xd   : > { %p199_p10 = pnand %p491_p6, %p198_p9 }
   0xe   : > { %p241_p11 = scmp.lt.s32.totalorder (!%p199_p10), %s644_s15, 1  ;;  %s238_s11 = sand.u32 (!%p199_p10), 1, %s636_s13  }
   0xf   : > { %202 = sbr.rel (%p199_p10) target bundleno = 388 (0x184), region = 32  ;;  %s239_s18 = scalar_lea.vmem (!%p199_p10), [#allocation2], %s238_s11 }
  0x10   : > { %s498_s19 = sshll.u32 (!%p199_p10), %s644_s15, 4  ;;  %s384_s21 = sshll.u32 (!%p199_p10), %s239_s18, 4  ;;  %s753_s21 = int_to_ptr.vmem [resolvable:$true] %s384_s21 }
  0x11   : > { %s371_s28 = scalar_lea.sflag (!%p199_p10), [#allocation3], %s238_s11  ;;  %s656_s29 = smov (!%p199_p10), [#allocation2]  }
  0x14   : > { %s242_s26 = scalar_select %p241_p11, %s644_s15, 1  ;;  %vm296_vm0 = vcmask 64512   ;;  %vm271_vm1 = vcmask 122880   ;;  %v654_v17 = vmov 0.0   ;;  %vm655_vm2 = vmmov 0  }
  0x15   : > { %509 = vmatprep.subr.bf16.mxu0 %v654_v17  ;;  %511 = vmatprep.mubr.msk.bf16.mxu0 %vm655_vm2, %v654_v17  ;;  %272 = vst.msk [vmem:[%s239_s18] sm:$0x1] %vm271_vm1, %v654_v17  ;;  %v309_v20 = vlaneseq  ;;  %vm320_vm3 = vcmask 130112   ;;  %vm323_vm4 = vcmask 130048   ;;  %s576_s15 = scalar_lea.vmem %s753_s21, 16 }
  0x16   : > { %s502_s27 = sshll.u32 %s242_s26, 4  ;;  %s265_s30 = scalar_lea.vmem %s802_s2, %s242_s26 }
  0x17   : > { %s261_s6 = scalar_lea.vmem %s801_s1, %s502_s27  ;;  %v496_v0 = vld [vmem:[%s265_s30] ss:$0 sm:$0xff]  ;;  %s501_s7 = sshll.u32 %s242_s26, 3  ;;  %v310_v21 = vand.u32 127, %v309_v20  ;;  %v312_v23 = vshrl.u32 %v309_v20, 7 }
  0x18   : > { %v285_v1 = vld [vmem:[%s261_s6] sm:$0xff]  ;;  %v286_v2 = vld [vmem:[%s261_s6 + $0x8] sm:$0xff]  ;;  %s251_s10 = scalar_lea.vmem %s800_s0, %s501_s7  ;;  %s751_s27 = scalar_lea.hbm %s803_s3, %s498_s19 }
  0x19   : > { %v294_v3 = vmul.f32 %v496_v0, %v285_v1  ;;  %v295_v4 = vmul.f32 %v496_v0, %v286_v2  ;;  %v504_v5 = vld [vmem:[%s251_s10] sm:$0xff]   ;;  %v315_v24 = vadd.s32 4294967288, %v310_v21  ;;  %v313_v26 = vsub.s32 %v310_v21, %v312_v23  ;;  %p577_p12 = scmp.ne.s32.totalorder %s753_s21, %s576_s15  ;;  %s580_s30 = sshll.u32 %s656_s29, 4  ;;  %s581_s30 = int_to_ptr.vmem [resolvable:$false] %s580_s30 }
  0x1a   : > { %v505_v6 = vunpack.c.l.bf16 %v504_v5  ;;  %v506_v7 = vunpack.c.h.bf16 %v504_v5  ;;  %s582_s4 = scalar_lea.vmem %s581_s30, 32  ;;  %p583_p1 = scmp.lt.s32.totalorder %s753_s21, %s581_s30 }
  0x1b   : > { %v297_v8 = vsel %vm296_vm0, %v294_v3, 0.0  ;;  %v300_v11 = vsel %vm296_vm0, %v295_v4, 0.0  ;;  %v318_v27 = vsub.s32 %v315_v24, %v312_v23  ;;  %p578_p13 = pnand %p577_p12, %p717_p4  ;;  %p584_p2 = scmp.lt.s32.totalorder %s582_s4, %s576_s15 }
  0x1c   : > { %298 = vadd.xlane.f32.xlu0 %v297_v8  ;;  %v277_v9 = vmul.f32 0.5, %v505_v6  ;;  %v278_v10 = vmul.f32 0.5, %v506_v7  ;;  %v303_v35 = vld [vmem:[%s239_s18] sm:$0x1] }
  0x1d   : > { %p579_p0 = pneg %p578_p13  ;;  %p585_p3 = por %p584_p2, %p583_p1 }
  0x1e   : > { %572 = vtanh.f32 %v277_v9 }
  0x1f   : > { %574 = vtanh.f32 %v278_v10  ;;  %p586_p5 = pnand %p585_p3, %p579_p0 }
  0x20   : > { %301 = vadd.xlane.f32.xlu0 %v300_v11 }
  0x2b   : > { %v573_v12 = vpop.eup %572 }
  0x2c   : > { %v575_v13 = vpop.eup %574  ;;  %v281_v14 = vmul.f32 0.5, %v573_v12 }
  0x2d   : > { %v282_v15 = vmul.f32 0.5, %v575_v13 }
  0x2e   : > { %v283_v16 = vadd.f32 0.5, %v281_v14 }
  0x2f   : > { %v284_v18 = vadd.f32 0.5, %v282_v15 }
  0x31   : > { %v305_v19 = vpack.c.bf16 %v284_v18, %v283_v16 }
  0x33   : > { %510 = vmatpush3.bf16.msra.mxu0 %v305_v19 }
  0xa5   : > { %v299_v22 = vpop.xlane.xlu0 %298 }
  0xa9   : > { %v302_v25 = vpop.xlane.xlu0 %301 }
  0xaa   : > { %v304_v28 = vpack.c.bf16 %v302_v25, %v299_v22 }
  0xac   : > { %v307_v29 = vunpack.c.l.b16 %v304_v28  ;;  %v308_v30 = vunpack.c.h.b16 %v304_v28 }
  0xae   : > { %v314_v31 = vrot.slane %v307_v29, %v313_v26  ;;  %v319_v32 = vrot.slane %v308_v30, %v318_v27 }
  0xb0   : > { %v321_v33 = vsel %vm320_vm3, %v319_v32, %v314_v31 }
  0xb1   : > { %v322_v34 = vpack.c.b16 %v321_v33, %v321_v33 }
  0xb3   : > { %512 = vmatmul.mubr.msk.bf16.vlgmr.msra.gmra.mxu0 %vm323_vm4, %v322_v34 }
 0x173   : > { %v361_v36 = vpop.f32.mrf.mxu0 }
 0x174   : > { %v367_v37 = vadd.f32 %v361_v36, %v303_v35 }
 0x175   : > { %v513_v38 = vpop.f32.mrf.mxu0 }
 0x176   : > { %369 = vst.msk [vmem:[%s239_s18] sm:$0x1] %vm271_vm1, %v367_v37 }
 0x177   : > { %v364_v39 = vpop.f32.mrf.mxu0 }
 0x178   : > { %589 = shalt.err (!%p586_p5)
}
 0x179   : > { %s590_s5 = scalar_lea.hbm %s751_s27, 16  ;;  %s594_s8 = scalar_lea.hbm %s803_s3, 32 }
 0x17a   : > { %p591_p6 = scmp.ne.s32.totalorder %s751_s27, %s590_s5  ;;  %p595_p10 = scmp.lt.s32.totalorder %s751_s27, %s803_s3 }
 0x17b   : > { %p596_p11 = scmp.lt.s32.totalorder %s594_s8, %s590_s5 }
 0x17c   : > { %p592_p7 = pnand %p591_p6, %p717_p4 }
 0x17d   : > { %p597_p12 = por %p596_p11, %p595_p10 }
 0x17e   : > { %p593_p9 = pneg %p592_p7 }
 0x180   : > { %p598_p13 = pnand %p597_p12, %p593_p9 }
 0x182   : > { %601 = shalt.err (!%p598_p13)
}
 0x183   : > { %515 = dma.vmem_to_hbm [thread:$0]  (%p717_p4), %s753_s21, 16, %s751_s27, %s371_s28   ;;  %v514_v40 = vpop.f32.mrf.mxu0 }
 0x184 PF: > { %p521_p0 = scmp.ge.s32.totalorder %s652_s17, 2  ;;  %s396_s11 = sand.u32 1, %s632_s12  }
 0x185   : > { %s397_s18 = scalar_lea.sflag [#allocation3], %s396_s11 }
 0x186   : > { %p518_p1 = pnand %p521_p0, %p724_p8 }
 0x188   : > { %p519_p2 = pneg %p518_p1 }
 0x18a   : > { %627 = dma.done.wait (%p519_p2), %s397_s18, 16  }
 0x18b   : > { %629 = vsyncadd (%p519_p2), %s397_s18, 4294967280  ;;  %s16_s17 = sadd.s32 1, %s652_s17   ;;  %s806_s12 = smov %s636_s13 }
 0x18c   : > { %p13_p3 = scmp.ge.s32.totalorder %s16_s17, 4   ;;  %s807_s13 = smov %s640_s14 }
 0x18d   : > { %s808_s14 = smov %s730_s25  ;;  %s809_s15 = smov %s648_s16 }
 0x18e   : > { %s810_s16 = smov %s812_s20  ;;  %15 = sbr.rel (!%p13_p3) target bundleno = 4 (0x4), region = 77 }
 0x193   :  { %401 = vsyncpa [#allocation3], 1 }
 0x194   :  { %403 = vsyncpa [#allocation3 + $0x1], 1 }

</bundles_post_ra>
